<compile_context>
chip_gen: v7x
topology: tpu7x:2x2x1
jax: 0.10.0
libtpu: 0.0.40
codegen_flags: <defaults>
</compile_context>

<pallas_src>
import jax
import jax.numpy as jnp
from jax import lax
from jax.experimental import pallas as pl
from jax.experimental.pallas import tpu as pltpu

SMOOTH = 1.0

_LANE = 128
_ELEMS_PER_TILE = 512 * 1024     # ~2 MiB f32 / ~1 MiB bf16 per buffered input
_MAX_LANE_GROUPS = 256           # bounds the in-kernel unroll (ts <= 32768)


def _cdiv(a, b):
    return -(-a // b)


def _round_up(x, m):
    return _cdiv(x, m) * m


def _round_down(x, m):
    return (x // m) * m


def _vmem_capacity_bytes():
    """Per-TensorCore VMEM budget; clamped to 64 MiB so v7x megacore is safe."""
    cap = 64 * 1024 * 1024
    try:
        info = pltpu.get_tpu_info()
        v = int(getattr(info, "vmem_capacity_bytes", 0) or 0)
        if v > 0:
            cap = v
    except Exception:
        pass
    return min(cap, 64 * 1024 * 1024)


def _make_dice_partial_kernel(*, tnc, ts, KT, S, need_mask):
    """Per-tile partial-sum kernel.

    Folds a (tnc, ts) tile of inputs/targets into lane-dense (tnc, 128) f32
    partial sums (intersection and x+t) with pure VALU adds over 128-lane
    chunks, accumulating into output blocks resident across the reduction
    axis.  The final cross-lane reduce is deferred to the wrapper.
    """
    groups = ts // _LANE
    nacc = min(4, groups)   # independent partials to shorten the add chain

    def kernel(x_ref, t_ref, inter_ref, denom_ref):
        k = pl.program_id(2)

        @pl.when(k == 0)
        def _():
            inter_ref[...] = jnp.zeros_like(inter_ref)
            denom_ref[...] = jnp.zeros_like(denom_ref)

        if need_mask:
            p = pl.program_id(0)
            base = (p * KT + k) * ts          # global lane offset of this tile
            lane = lax.broadcasted_iota(jnp.int32, (tnc, _LANE), 1)

        acc_i = [jnp.zeros((tnc, _LANE), jnp.float32) for _ in range(nacc)]
        acc_d = [jnp.zeros((tnc, _LANE), jnp.float32) for _ in range(nacc)]

        for g in range(groups):
            sl = slice(g * _LANE, (g + 1) * _LANE)
            xg = x_ref[:, sl].astype(jnp.float32)
            tg = t_ref[:, sl].astype(jnp.float32)
            pg = xg * tg
            sg = xg + tg                      # sum(x)+sum(t) == sum(x+t)
            if need_mask:
                # jnp.where selects, so garbage (even NaN/Inf) past S is inert.
                valid = (base + g * _LANE + lane) < S
                pg = jnp.where(valid, pg, 0.0)
                sg = jnp.where(valid, sg, 0.0)
            j = g % nacc
            acc_i[j] = acc_i[j] + pg
            acc_d[j] = acc_d[j] + sg

        total_i = acc_i[0]
        total_d = acc_d[0]
        for j in range(1, nacc):
            total_i = total_i + acc_i[j]
            total_d = total_d + acc_d[j]

        # Lane-dense accumulation into the resident output blocks.
        inter_ref[0] += total_i
        denom_ref[0] += total_d

    return kernel


def logcosh_dice_loss(inputs, targets, *, smooth=SMOOTH):
    """LogCoshDiceLoss forward for (N, C, D, H, W) inputs/targets."""
    assert inputs.shape == targets.shape and inputs.ndim == 5
    N, C, D, H, W = inputs.shape
    NC = N * C
    S = D * H * W

    # Free row-major views; both operands keep their native dtype (no downcast
    # of f32 targets, minimal HBM traffic for bf16 operands).
    x2 = inputs.reshape(NC, S)
    t2 = targets.reshape(NC, S)

    ix = jnp.dtype(x2.dtype).itemsize
    it = jnp.dtype(t2.dtype).itemsize
    # Sublane packing: 8 rows for 32-bit, 16 for 16-bit, 32 for 8-bit dtypes.
    sub = max(8 * max(1, 4 // ix), 8 * max(1, 4 // it))

    # ---- NC (row) tiling: balanced blocks of <= 128 rows; the ragged tail
    # rows are computed on garbage and dropped at writeback (no pad copy). ----
    ni = _cdiv(_round_up(NC, sub), 128)
    tnc = _round_up(_cdiv(NC, ni), sub)
    ni = _cdiv(NC, tnc)

    # ---- Spatial (lane) tiling: ~1-2 MiB per buffered input, capped so the
    # in-kernel lane-group unroll stays modest; balanced to shrink the ragged
    # tail.  No pad copy: the ragged tail is masked in-kernel. ----
    s128 = _round_up(S, _LANE)
    ts = _round_down(max(_ELEMS_PER_TILE // tnc, _LANE), _LANE)
    ts = max(_LANE, min(ts, _MAX_LANE_GROUPS * _LANE, s128))
    kt = _cdiv(S, ts)
    ts = min(ts, _round_up(_cdiv(s128, kt), _LANE))     # balance the tiles
    kt = _cdiv(S, ts)

    # ---- Megacore: if the NC axis collapses to one tile, split the spatial
    # reduction 2-ways on a leading parallel axis so both v7x TensorCores get
    # work; size-1 axis (and 1-TC chips) costs nothing. ----
    np_ = 2 if (ni == 1 and kt >= 2) else 1
    KT = _cdiv(kt, np_)
    # Mask whenever the (np_, KT) tiling over-covers S (ragged tail and/or the
    # duplicated clamped block of the 2-way split).
    need_mask = (np_ * KT * ts) != S
    kt_last = kt - 1

    def in_map(p, i, k):
        # Clamp so the duplicated tail block of the 2-way split stays in
        # bounds; its contribution is zeroed by the in-kernel mask.
        return (i, jnp.minimum(p * KT + k, kt_last))

    def out_map(p, i, k):
        return (p, i, 0)

    kernel = _make_dice_partial_kernel(tnc=tnc, ts=ts, KT=KT, S=S,
                                       need_mask=need_mask)

    # VMEM budget: double-buffered input tiles + slack for the small per-chunk
    # f32 temporaries and lane-dense accumulators (no full-tile f32 upcast is
    # materialized since chunks are read straight from the refs).
    cap = _vmem_capacity_bytes()
    in_bytes = 2 * tnc * ts * (ix + it)
    vmem_limit = int(min(max(32 << 20, in_bytes + (16 << 20)), cap * 9 // 10))

    # TODO(synk): sweep pl.Buffered(3) on the input BlockSpecs (DMA-latency
    # hiding) once a hardware sweep is possible; default 2-deep kept here.
    inter, denom = pl.pallas_call(
        kernel,
        out_shape=(
            jax.ShapeDtypeStruct((np_, NC, _LANE), jnp.float32),
            jax.ShapeDtypeStruct((np_, NC, _LANE), jnp.float32),
        ),
        grid_spec=pltpu.PrefetchScalarGridSpec(
            num_scalar_prefetch=0,
            grid=(np_, ni, KT),
            in_specs=[
                pl.BlockSpec((tnc, ts), in_map),
                pl.BlockSpec((tnc, ts), in_map),
            ],
            out_specs=(
                pl.BlockSpec((1, tnc, _LANE), out_map),
                pl.BlockSpec((1, tnc, _LANE), out_map),
            ),
        ),
        compiler_params=pltpu.CompilerParams(
            dimension_semantics=("parallel", "parallel", "arbitrary"),
            vmem_limit_bytes=vmem_limit,
        ),
    )(x2, t2)

    # Tiny finalize in the wrapper: fold the spatial-split planes and the 128
    # lane groups, then dice -> mean -> log(cosh(.)).
    inter = jnp.sum(inter, axis=(0, 2))
    denom = jnp.sum(denom, axis=(0, 2))
    dice = (2.0 * inter + smooth) / (denom + smooth)
    loss = 1.0 - jnp.mean(dice)              # size_average=True, weight=None
    # Numerically stable log(cosh(x)) = |x| + log1p(exp(-2|x|)) - log(2).
    a = jnp.abs(loss)
    return a + jnp.log1p(jnp.exp(-2.0 * a)) - jnp.log(2.0)


def _reference(inputs, targets, smooth=SMOOTH):
    inter = jnp.sum(inputs * targets, axis=(2, 3, 4))
    dice = (2.0 * inter + smooth) / (
        jnp.sum(inputs, axis=(2, 3, 4)) + jnp.sum(targets, axis=(2, 3, 4)) + smooth
    )
    loss = 1.0 - jnp.mean(dice)
    return jnp.log(jnp.cosh(loss))


if __name__ == "__main__":
    key = jax.random.PRNGKey(0)
    k1, k2, k3, k4, k5, k6 = jax.random.split(key, 6)

    # Case 1: aligned f32 volumetric input (N, C, D, H, W).
    N, C, D, H, W = 2, 4, 8, 16, 16
    x = jax.nn.sigmoid(jax.random.normal(k1, (N, C, D, H, W), dtype=jnp.float32))
    t = (jax.random.uniform(k2, (N, C, D, H, W)) > 0.5).astype(jnp.float32)
    out = jax.block_until_ready(logcosh_dice_loss(x, t))
    ref = _reference(x, t)
    assert jnp.allclose(out, ref, rtol=1e-5, atol=1e-6), (out, ref)

    # Case 2: unaligned shape streamed in native bf16 (exercises the no-pad
    # ragged-tail masking path and half-width HBM streaming).
    N2, C2, D2, H2, W2 = 2, 3, 5, 7, 9
    xb = jax.nn.sigmoid(
        jax.random.normal(k3, (N2, C2, D2, H2, W2), dtype=jnp.float32)
    ).astype(jnp.bfloat16)
    tb = (jax.random.uniform(k4, (N2, C2, D2, H2, W2)) > 0.5).astype(jnp.bfloat16)
    out2 = jax.block_until_ready(logcosh_dice_loss(xb, tb))
    ref2 = _reference(xb.astype(jnp.float32), tb.astype(jnp.float32))
    assert jnp.allclose(out2, ref2, rtol=1e-4, atol=1e-5), (out2, ref2)

    # Case 3: small NC with a multi-tile spatial reduction — exercises the
    # 2-way spatial split (megacore path), the k>0 accumulation, the clamped
    # duplicate tail block, and the unaligned-tail mask, all without padding.
    N3, C3, D3, H3, W3 = 1, 2, 25, 56, 50
    x3 = jax.nn.sigmoid(jax.random.normal(k5, (N3, C3, D3, H3, W3), jnp.float32))
    t3 = (jax.random.uniform(k6, (N3, C3, D3, H3, W3)) > 0.5).astype(jnp.float32)
    out3 = jax.block_until_ready(logcosh_dice_loss(x3, t3))
    ref3 = _reference(x3, t3)
    assert jnp.allclose(out3, ref3, rtol=1e-4, atol=1e-5), (out3, ref3)

    print("KERNEL_OK")
</pallas_src>

<mosaic_0001>
module attributes {stable_mosaic.version = 11 : i64} {
  func.func @kernel(%arg0: i32, %arg1: i32, %arg2: i32, %arg3: memref<8x2048xf32, #tpu.memory_space<vmem>>, %arg4: memref<8x2048xf32, #tpu.memory_space<vmem>>, %arg5: memref<1x8x128xf32, #tpu.memory_space<vmem>>, %arg6: memref<1x8x128xf32, #tpu.memory_space<vmem>>) attributes {dimension_semantics = [#tpu.dimension_semantics<parallel>, #tpu.dimension_semantics<parallel>, #tpu.dimension_semantics<arbitrary>], iteration_bounds = array<i64: 1, 1, 1>, scalar_prefetch = 0 : i64, scratch_operands = 0 : i64, tpu.core_type = #tpu.core_type<tc>, window_params = [{transform_indices = @transform_0, window_bounds = array<i64: 8, 2048>}, {transform_indices = @transform_1, window_bounds = array<i64: 8, 2048>}, {transform_indices = @transform_2, window_bounds = array<i64: 1, 8, 128>}, {transform_indices = @transform_3, window_bounds = array<i64: 1, 8, 128>}]} {
    %c0_i32 = arith.constant 0 : i32
    %0 = arith.cmpi eq, %arg2, %c0_i32 : i32
    %1 = arith.extui %0 : i1 to i32
    %c0_i32_0 = arith.constant 0 : i32
    %2 = arith.cmpi ne, %1, %c0_i32_0 : i32
    scf.if %2 {
      %cst_68 = arith.constant 0.000000e+00 : f32
      %125 = vector.broadcast %cst_68 : f32 to vector<1x8x128xf32>
      %c0_69 = arith.constant 0 : index
      %c0_70 = arith.constant 0 : index
      %c0_71 = arith.constant 0 : index
      %126 = vector.load %arg5[%c0_69, %c0_70, %c0_71] : memref<1x8x128xf32, #tpu.memory_space<vmem>>, vector<1x8x128xf32>
      tpu.vector_store %arg5[%c0_69, %c0_70, %c0_71], %125 {strides = array<i32>} : memref<1x8x128xf32, #tpu.memory_space<vmem>>, vector<1x8x128xf32>,
      %cst_72 = arith.constant 0.000000e+00 : f32
      %127 = vector.broadcast %cst_72 : f32 to vector<1x8x128xf32>
      %c0_73 = arith.constant 0 : index
      %c0_74 = arith.constant 0 : index
      %c0_75 = arith.constant 0 : index
      %128 = vector.load %arg6[%c0_73, %c0_74, %c0_75] : memref<1x8x128xf32, #tpu.memory_space<vmem>>, vector<1x8x128xf32>
      tpu.vector_store %arg6[%c0_73, %c0_74, %c0_75], %127 {strides = array<i32>} : memref<1x8x128xf32, #tpu.memory_space<vmem>>, vector<1x8x128xf32>,
    } else {
    }
    %cst = arith.constant 0.000000e+00 : f32
    %3 = vector.broadcast %cst : f32 to vector<8x128xf32>
    %cst_1 = arith.constant 0.000000e+00 : f32
    %4 = vector.broadcast %cst_1 : f32 to vector<8x128xf32>
    %cst_2 = arith.constant 0.000000e+00 : f32
    %5 = vector.broadcast %cst_2 : f32 to vector<8x128xf32>
    %cst_3 = arith.constant 0.000000e+00 : f32
    %6 = vector.broadcast %cst_3 : f32 to vector<8x128xf32>
    %cst_4 = arith.constant 0.000000e+00 : f32
    %7 = vector.broadcast %cst_4 : f32 to vector<8x128xf32>
    %cst_5 = arith.constant 0.000000e+00 : f32
    %8 = vector.broadcast %cst_5 : f32 to vector<8x128xf32>
    %cst_6 = arith.constant 0.000000e+00 : f32
    %9 = vector.broadcast %cst_6 : f32 to vector<8x128xf32>
    %cst_7 = arith.constant 0.000000e+00 : f32
    %10 = vector.broadcast %cst_7 : f32 to vector<8x128xf32>
    %c0 = arith.constant 0 : index
    %c0_8 = arith.constant 0 : index
    %11 = vector.load %arg3[%c0, %c0_8] : memref<8x2048xf32, #tpu.memory_space<vmem>>, vector<8x128xf32>
    %c0_9 = arith.constant 0 : index
    %c0_10 = arith.constant 0 : index
    %12 = vector.load %arg4[%c0_9, %c0_10] : memref<8x2048xf32, #tpu.memory_space<vmem>>, vector<8x128xf32>
    %13 = arith.mulf %11, %12 : vector<8x128xf32>
    %14 = arith.addf %11, %12 : vector<8x128xf32>
    %15 = arith.addf %3, %13 : vector<8x128xf32>
    %16 = arith.addf %7, %14 : vector<8x128xf32>
    %c0_11 = arith.constant 0 : index
    %c128 = arith.constant 128 : index
    %17 = vector.load %arg3[%c0_11, %c128] : memref<8x2048xf32, #tpu.memory_space<vmem>>, vector<8x128xf32>
    %c0_12 = arith.constant 0 : index
    %c128_13 = arith.constant 128 : index
    %18 = vector.load %arg4[%c0_12, %c128_13] : memref<8x2048xf32, #tpu.memory_space<vmem>>, vector<8x128xf32>
    %19 = arith.mulf %17, %18 : vector<8x128xf32>
    %20 = arith.addf %17, %18 : vector<8x128xf32>
    %21 = arith.addf %4, %19 : vector<8x128xf32>
    %22 = arith.addf %8, %20 : vector<8x128xf32>
    %c0_14 = arith.constant 0 : index
    %c256 = arith.constant 256 : index
    %23 = vector.load %arg3[%c0_14, %c256] : memref<8x2048xf32, #tpu.memory_space<vmem>>, vector<8x128xf32>
    %c0_15 = arith.constant 0 : index
    %c256_16 = arith.constant 256 : index
    %24 = vector.load %arg4[%c0_15, %c256_16] : memref<8x2048xf32, #tpu.memory_space<vmem>>, vector<8x128xf32>
    %25 = arith.mulf %23, %24 : vector<8x128xf32>
    %26 = arith.addf %23, %24 : vector<8x128xf32>
    %27 = arith.addf %5, %25 : vector<8x128xf32>
    %28 = arith.addf %9, %26 : vector<8x128xf32>
    %c0_17 = arith.constant 0 : index
    %c384 = arith.constant 384 : index
    %29 = vector.load %arg3[%c0_17, %c384] : memref<8x2048xf32, #tpu.memory_space<vmem>>, vector<8x128xf32>
    %c0_18 = arith.constant 0 : index
    %c384_19 = arith.constant 384 : index
    %30 = vector.load %arg4[%c0_18, %c384_19] : memref<8x2048xf32, #tpu.memory_space<vmem>>, vector<8x128xf32>
    %31 = arith.mulf %29, %30 : vector<8x128xf32>
    %32 = arith.addf %29, %30 : vector<8x128xf32>
    %33 = arith.addf %6, %31 : vector<8x128xf32>
    %34 = arith.addf %10, %32 : vector<8x128xf32>
    %c0_20 = arith.constant 0 : index
    %c512 = arith.constant 512 : index
    %35 = vector.load %arg3[%c0_20, %c512] : memref<8x2048xf32, #tpu.memory_space<vmem>>, vector<8x128xf32>
    %c0_21 = arith.constant 0 : index
    %c512_22 = arith.constant 512 : index
    %36 = vector.load %arg4[%c0_21, %c512_22] : memref<8x2048xf32, #tpu.memory_space<vmem>>, vector<8x128xf32>
    %37 = arith.mulf %35, %36 : vector<8x128xf32>
    %38 = arith.addf %35, %36 : vector<8x128xf32>
    %39 = arith.addf %15, %37 : vector<8x128xf32>
    %40 = arith.addf %16, %38 : vector<8x128xf32>
    %c0_23 = arith.constant 0 : index
    %c640 = arith.constant 640 : index
    %41 = vector.load %arg3[%c0_23, %c640] : memref<8x2048xf32, #tpu.memory_space<vmem>>, vector<8x128xf32>
    %c0_24 = arith.constant 0 : index
    %c640_25 = arith.constant 640 : index
    %42 = vector.load %arg4[%c0_24, %c640_25] : memref<8x2048xf32, #tpu.memory_space<vmem>>, vector<8x128xf32>
    %43 = arith.mulf %41, %42 : vector<8x128xf32>
    %44 = arith.addf %41, %42 : vector<8x128xf32>
    %45 = arith.addf %21, %43 : vector<8x128xf32>
    %46 = arith.addf %22, %44 : vector<8x128xf32>
    %c0_26 = arith.constant 0 : index
    %c768 = arith.constant 768 : index
    %47 = vector.load %arg3[%c0_26, %c768] : memref<8x2048xf32, #tpu.memory_space<vmem>>, vector<8x128xf32>
    %c0_27 = arith.constant 0 : index
    %c768_28 = arith.constant 768 : index
    %48 = vector.load %arg4[%c0_27, %c768_28] : memref<8x2048xf32, #tpu.memory_space<vmem>>, vector<8x128xf32>
    %49 = arith.mulf %47, %48 : vector<8x128xf32>
    %50 = arith.addf %47, %48 : vector<8x128xf32>
    %51 = arith.addf %27, %49 : vector<8x128xf32>
    %52 = arith.addf %28, %50 : vector<8x128xf32>
    %c0_29 = arith.constant 0 : index
    %c896 = arith.constant 896 : index
    %53 = vector.load %arg3[%c0_29, %c896] : memref<8x2048xf32, #tpu.memory_space<vmem>>, vector<8x128xf32>
    %c0_30 = arith.constant 0 : index
    %c896_31 = arith.constant 896 : index
    %54 = vector.load %arg4[%c0_30, %c896_31] : memref<8x2048xf32, #tpu.memory_space<vmem>>, vector<8x128xf32>
    %55 = arith.mulf %53, %54 : vector<8x128xf32>
    %56 = arith.addf %53, %54 : vector<8x128xf32>
    %57 = arith.addf %33, %55 : vector<8x128xf32>
    %58 = arith.addf %34, %56 : vector<8x128xf32>
    %c0_32 = arith.constant 0 : index
    %c1024 = arith.constant 1024 : index
    %59 = vector.load %arg3[%c0_32, %c1024] : memref<8x2048xf32, #tpu.memory_space<vmem>>, vector<8x128xf32>
    %c0_33 = arith.constant 0 : index
    %c1024_34 = arith.constant 1024 : index
    %60 = vector.load %arg4[%c0_33, %c1024_34] : memref<8x2048xf32, #tpu.memory_space<vmem>>, vector<8x128xf32>
    %61 = arith.mulf %59, %60 : vector<8x128xf32>
    %62 = arith.addf %59, %60 : vector<8x128xf32>
    %63 = arith.addf %39, %61 : vector<8x128xf32>
    %64 = arith.addf %40, %62 : vector<8x128xf32>
    %c0_35 = arith.constant 0 : index
    %c1152 = arith.constant 1152 : index
    %65 = vector.load %arg3[%c0_35, %c1152] : memref<8x2048xf32, #tpu.memory_space<vmem>>, vector<8x128xf32>
    %c0_36 = arith.constant 0 : index
    %c1152_37 = arith.constant 1152 : index
    %66 = vector.load %arg4[%c0_36, %c1152_37] : memref<8x2048xf32, #tpu.memory_space<vmem>>, vector<8x128xf32>
    %67 = arith.mulf %65, %66 : vector<8x128xf32>
    %68 = arith.addf %65, %66 : vector<8x128xf32>
    %69 = arith.addf %45, %67 : vector<8x128xf32>
    %70 = arith.addf %46, %68 : vector<8x128xf32>
    %c0_38 = arith.constant 0 : index
    %c1280 = arith.constant 1280 : index
    %71 = vector.load %arg3[%c0_38, %c1280] : memref<8x2048xf32, #tpu.memory_space<vmem>>, vector<8x128xf32>
    %c0_39 = arith.constant 0 : index
    %c1280_40 = arith.constant 1280 : index
    %72 = vector.load %arg4[%c0_39, %c1280_40] : memref<8x2048xf32, #tpu.memory_space<vmem>>, vector<8x128xf32>
    %73 = arith.mulf %71, %72 : vector<8x128xf32>
    %74 = arith.addf %71, %72 : vector<8x128xf32>
    %75 = arith.addf %51, %73 : vector<8x128xf32>
    %76 = arith.addf %52, %74 : vector<8x128xf32>
    %c0_41 = arith.constant 0 : index
    %c1408 = arith.constant 1408 : index
    %77 = vector.load %arg3[%c0_41, %c1408] : memref<8x2048xf32, #tpu.memory_space<vmem>>, vector<8x128xf32>
    %c0_42 = arith.constant 0 : index
    %c1408_43 = arith.constant 1408 : index
    %78 = vector.load %arg4[%c0_42, %c1408_43] : memref<8x2048xf32, #tpu.memory_space<vmem>>, vector<8x128xf32>
    %79 = arith.mulf %77, %78 : vector<8x128xf32>
    %80 = arith.addf %77, %78 : vector<8x128xf32>
    %81 = arith.addf %57, %79 : vector<8x128xf32>
    %82 = arith.addf %58, %80 : vector<8x128xf32>
    %c0_44 = arith.constant 0 : index
    %c1536 = arith.constant 1536 : index
    %83 = vector.load %arg3[%c0_44, %c1536] : memref<8x2048xf32, #tpu.memory_space<vmem>>, vector<8x128xf32>
    %c0_45 = arith.constant 0 : index
    %c1536_46 = arith.constant 1536 : index
    %84 = vector.load %arg4[%c0_45, %c1536_46] : memref<8x2048xf32, #tpu.memory_space<vmem>>, vector<8x128xf32>
    %85 = arith.mulf %83, %84 : vector<8x128xf32>
    %86 = arith.addf %83, %84 : vector<8x128xf32>
    %87 = arith.addf %63, %85 : vector<8x128xf32>
    %88 = arith.addf %64, %86 : vector<8x128xf32>
    %c0_47 = arith.constant 0 : index
    %c1664 = arith.constant 1664 : index
    %89 = vector.load %arg3[%c0_47, %c1664] : memref<8x2048xf32, #tpu.memory_space<vmem>>, vector<8x128xf32>
    %c0_48 = arith.constant 0 : index
    %c1664_49 = arith.constant 1664 : index
    %90 = vector.load %arg4[%c0_48, %c1664_49] : memref<8x2048xf32, #tpu.memory_space<vmem>>, vector<8x128xf32>
    %91 = arith.mulf %89, %90 : vector<8x128xf32>
    %92 = arith.addf %89, %90 : vector<8x128xf32>
    %93 = arith.addf %69, %91 : vector<8x128xf32>
    %94 = arith.addf %70, %92 : vector<8x128xf32>
    %c0_50 = arith.constant 0 : index
    %c1792 = arith.constant 1792 : index
    %95 = vector.load %arg3[%c0_50, %c1792] : memref<8x2048xf32, #tpu.memory_space<vmem>>, vector<8x128xf32>
    %c0_51 = arith.constant 0 : index
    %c1792_52 = arith.constant 1792 : index
    %96 = vector.load %arg4[%c0_51, %c1792_52] : memref<8x2048xf32, #tpu.memory_space<vmem>>, vector<8x128xf32>
    %97 = arith.mulf %95, %96 : vector<8x128xf32>
    %98 = arith.addf %95, %96 : vector<8x128xf32>
    %99 = arith.addf %75, %97 : vector<8x128xf32>
    %100 = arith.addf %76, %98 : vector<8x128xf32>
    %c0_53 = arith.constant 0 : index
    %c1920 = arith.constant 1920 : index
    %101 = vector.load %arg3[%c0_53, %c1920] : memref<8x2048xf32, #tpu.memory_space<vmem>>, vector<8x128xf32>
    %c0_54 = arith.constant 0 : index
    %c1920_55 = arith.constant 1920 : index
    %102 = vector.load %arg4[%c0_54, %c1920_55] : memref<8x2048xf32, #tpu.memory_space<vmem>>, vector<8x128xf32>
    %103 = arith.mulf %101, %102 : vector<8x128xf32>
    %104 = arith.addf %101, %102 : vector<8x128xf32>
    %105 = arith.addf %81, %103 : vector<8x128xf32>
    %106 = arith.addf %82, %104 : vector<8x128xf32>
    %107 = arith.addf %87, %93 : vector<8x128xf32>
    %108 = arith.addf %88, %94 : vector<8x128xf32>
    %109 = arith.addf %107, %99 : vector<8x128xf32>
    %110 = arith.addf %108, %100 : vector<8x128xf32>
    %111 = arith.addf %109, %105 : vector<8x128xf32>
    %112 = arith.addf %110, %106 : vector<8x128xf32>
    %c0_56 = arith.constant 0 : index
    %c0_57 = arith.constant 0 : index
    %c0_58 = arith.constant 0 : index
    %113 = vector.load %arg5[%c0_56, %c0_57, %c0_58] : memref<1x8x128xf32, #tpu.memory_space<vmem>>, vector<1x8x128xf32>
    %114 = vector.shape_cast %113 : vector<1x8x128xf32> to vector<8x128xf32>
    %115 = arith.addf %114, %111 : vector<8x128xf32>
    %c0_59 = arith.constant 0 : index
    %c0_60 = arith.constant 0 : index
    %c0_61 = arith.constant 0 : index
    %116 = vector.load %arg5[%c0_59, %c0_60, %c0_61] : memref<1x8x128xf32, #tpu.memory_space<vmem>>, vector<1x8x128xf32>
    %117 = vector.shape_cast %116 : vector<1x8x128xf32> to vector<8x128xf32>
    %118 = vector.shape_cast %115 : vector<8x128xf32> to vector<1x8x128xf32>
    tpu.vector_store %arg5[%c0_59, %c0_60, %c0_61], %118 {strides = array<i32>} : memref<1x8x128xf32, #tpu.memory_space<vmem>>, vector<1x8x128xf32>,
    %c0_62 = arith.constant 0 : index
    %c0_63 = arith.constant 0 : index
    %c0_64 = arith.constant 0 : index
    %119 = vector.load %arg6[%c0_62, %c0_63, %c0_64] : memref<1x8x128xf32, #tpu.memory_space<vmem>>, vector<1x8x128xf32>
    %120 = vector.shape_cast %119 : vector<1x8x128xf32> to vector<8x128xf32>
    %121 = arith.addf %120, %112 : vector<8x128xf32>
    %c0_65 = arith.constant 0 : index
    %c0_66 = arith.constant 0 : index
    %c0_67 = arith.constant 0 : index
    %122 = vector.load %arg6[%c0_65, %c0_66, %c0_67] : memref<1x8x128xf32, #tpu.memory_space<vmem>>, vector<1x8x128xf32>
    %123 = vector.shape_cast %122 : vector<1x8x128xf32> to vector<8x128xf32>
    %124 = vector.shape_cast %121 : vector<8x128xf32> to vector<1x8x128xf32>
    tpu.vector_store %arg6[%c0_65, %c0_66, %c0_67], %124 {strides = array<i32>} : memref<1x8x128xf32, #tpu.memory_space<vmem>>, vector<1x8x128xf32>,
    return
  }
  func.func @transform_0(%arg0: i32, %arg1: i32, %arg2: i32) -> (i32, i32) {
    %c1_i32 = arith.constant 1 : i32
    %0 = arith.muli %arg0, %c1_i32 : i32
    %1 = arith.addi %0, %arg2 : i32
    %c0_i32 = arith.constant 0 : i32
    %2 = arith.minsi %1, %c0_i32 : i32
    %c0_i32_0 = arith.constant 0 : i32
    return %arg1, %2 : i32, i32
  }
  func.func @transform_1(%arg0: i32, %arg1: i32, %arg2: i32) -> (i32, i32) {
    %c1_i32 = arith.constant 1 : i32
    %0 = arith.muli %arg0, %c1_i32 : i32
    %1 = arith.addi %0, %arg2 : i32
    %c0_i32 = arith.constant 0 : i32
    %2 = arith.minsi %1, %c0_i32 : i32
    %c0_i32_0 = arith.constant 0 : i32
    return %arg1, %2 : i32, i32
  }
  func.func @transform_2(%arg0: i32, %arg1: i32, %arg2: i32) -> (i32, i32, i32) {
    %c0_i32 = arith.constant 0 : i32
    %c0_i32_0 = arith.constant 0 : i32
    return %arg0, %arg1, %c0_i32 : i32, i32, i32
  }
  func.func @transform_3(%arg0: i32, %arg1: i32, %arg2: i32) -> (i32, i32, i32) {
    %c0_i32 = arith.constant 0 : i32
    %c0_i32_0 = arith.constant 0 : i32
    return %arg0, %arg1, %c0_i32 : i32, i32, i32
  }
}

</mosaic_0001>

<bundles_post_ra>
// kernel: tpu_custom_call.1
= control target key start
LH: loop header
LB: loop body
LE: loop exit
PB: predicated region body
PF: predicated region fallthrough
CT: control target
= control target key end

     0   :  { %9 = vsyncpa [#allocation3], 0  ;;  %s380_s0 = inlined_call_operand.hbm [shape: f32[8,2048], index: 0, kind: input, shape index: {}]   ;;  %s381_s1 = inlined_call_operand.hbm [shape: f32[8,2048], index: 1, kind: input, shape index: {}]   ;;  %s382_s2 = inlined_call_operand.hbm [shape: f32[1,8,128], index: 2, kind: output, shape index: {0}]   ;;  %s383_s3 = inlined_call_operand.hbm [shape: f32[1,8,128], index: 3, kind: output, shape index: {1}]  }
   0x1   :  { %10 = vsyncpa [#allocation6], 0 }
   0x2   :  { %11 = vsyncpa [#allocation4], 0 }
   0x3   :  { %12 = vsyncpa [#allocation9], 0  ;;  %s308_s12 = smov [#allocation2]   ;;  %s309_s14 = smov [#allocation5]  }
   0x4   :  { %s25_s13 = sshll.u32 %s308_s12, 4  ;;  %s41_s15 = sshll.u32 %s309_s14, 4  ;;  %s26_s13 = int_to_ptr.vmem [resolvable:$true] %s25_s13  ;;  %s42_s15 = int_to_ptr.vmem [resolvable:$true] %s41_s15 }
   0x5   :  { %s212_s18 = scalar_lea.hbm %s380_s0, 2048 }
   0x6   :  { %p213_p0 = scmp.ne.s32.totalorder %s380_s0, %s212_s18  ;;  %p216_p1 = scmp.lt.u32.totalorder %s212_s18, %s380_s0 }
   0x8   :  { %p218_p2 = pnand %p216_p1, %p213_p0 }
   0xa   :  { %221 = shalt.err (!%p218_p2)
}
   0xb   :  { %s222_s23 = scalar_lea.vmem %s26_s13, 2048  ;;  %p227_p4 = scmp.lt.s32.totalorder %s26_s13, %s26_s13 }
   0xc   :  { %p223_p3 = scmp.ne.s32.totalorder %s26_s13, %s222_s23  ;;  %p228_p5 = scmp.lt.s32.totalorder %s222_s23, %s222_s23 }
   0xe   :  { %p229_p6 = por %p228_p5, %p227_p4 }
  0x10   :  { %p230_p7 = pnand %p229_p6, %p223_p3 }
  0x12   :  { %233 = shalt.err (!%p230_p7)
}
  0x13   :  { %28 = dma.hbm_to_vmem [thread:$0]  %s380_s0, 2048, %s26_s13, [#allocation3]  }
  0x14   :  { %s234_s28 = scalar_lea.hbm %s381_s1, 2048 }
  0x15   :  { %p235_p8 = scmp.ne.s32.totalorder %s381_s1, %s234_s28  ;;  %p238_p9 = scmp.lt.u32.totalorder %s234_s28, %s381_s1 }
  0x17   :  { %p240_p10 = pnand %p238_p9, %p235_p8 }
  0x19   :  { %243 = shalt.err (!%p240_p10)
}
  0x1a   :  { %s244_s6 = scalar_lea.vmem %s42_s15, 2048  ;;  %p249_p12 = scmp.lt.s32.totalorder %s42_s15, %s42_s15 }
  0x1b   :  { %p245_p11 = scmp.ne.s32.totalorder %s42_s15, %s244_s6  ;;  %p250_p13 = scmp.lt.s32.totalorder %s244_s6, %s244_s6 }
  0x1d   :  { %p251_p0 = por %p250_p13, %p249_p12 }
  0x1f   :  { %p252_p1 = pnand %p251_p0, %p245_p11 }
  0x21   :  { %255 = shalt.err (!%p252_p1)
}
  0x22   :  { %44 = dma.hbm_to_vmem [thread:$0]  %s381_s1, 2048, %s42_s15, [#allocation6]  }
  0x23   :  { %300 = dma.done.wait [#allocation3], 2048  }
  0x24   :  { %301 = vsyncadd [#allocation3], 4294965248 }
  0x25   :  { %302 = dma.done.wait [#allocation6], 2048  }
  0x26   :  { %303 = vsyncadd [#allocation6], 4294965248  ;;  %v65_v0 = vld [vmem:[#allocation2] sm:$0xff]  ;;  %v71_v2 = vld [vmem:[#allocation2 + $0x8] sm:$0xff]  ;;  %s310_s1 = smov [#allocation7]   ;;  %s311_s9 = smov [#allocation8]  }
  0x27   :  { %v66_v1 = vld [vmem:[#allocation5] sm:$0xff]  ;;  %v72_v3 = vld [vmem:[#allocation5 + $0x8] sm:$0xff]  ;;  %v77_v4 = vld [vmem:[#allocation2 + $0x10] sm:$0xff]  ;;  %s179_s8 = sshll.u32 %s310_s1, 4  ;;  %s189_s10 = sshll.u32 %s311_s9, 4  ;;  %s180_s8 = int_to_ptr.vmem [resolvable:$true] %s179_s8  ;;  %s190_s10 = int_to_ptr.vmem [resolvable:$true] %s189_s10 }
  0x28   :  { %v78_v5 = vld [vmem:[#allocation5 + $0x10] sm:$0xff]  ;;  %v67_v6 = vmul.f32 %v66_v1, %v65_v0  ;;  %v73_v7 = vmul.f32 %v72_v3, %v71_v2  ;;  %v83_v8 = vld [vmem:[#allocation2 + $0x18] sm:$0xff]  ;;  %v89_v10 = vld [vmem:[#allocation2 + $0x20] sm:$0xff]  ;;  %v68_v16 = vadd.f32 %v66_v1, %v65_v0  ;;  %v74_v17 = vadd.f32 %v72_v3, %v71_v2  ;;  %s256_s11 = scalar_lea.vmem %s180_s8, 128  ;;  %p261_p3 = scmp.lt.s32.totalorder %s180_s8, %s180_s8 }
  0x29   :  { %v84_v9 = vld [vmem:[#allocation5 + $0x18] sm:$0xff]  ;;  %v79_v11 = vmul.f32 %v78_v5, %v77_v4  ;;  %v90_v13 = vld [vmem:[#allocation5 + $0x20] sm:$0xff]  ;;  %v95_v14 = vld [vmem:[#allocation2 + $0x28] sm:$0xff]  ;;  %v80_v29 = vadd.f32 %v78_v5, %v77_v4  ;;  %p257_p2 = scmp.ne.s32.totalorder %s180_s8, %s256_s11  ;;  %p262_p4 = scmp.lt.s32.totalorder %s256_s11, %s256_s11 }
  0x2a   :  { %v85_v12 = vmul.f32 %v84_v9, %v83_v8  ;;  %v96_v15 = vld [vmem:[#allocation5 + $0x28] sm:$0xff]  ;;  %v91_v18 = vmul.f32 %v90_v13, %v89_v10  ;;  %v101_v20 = vld [vmem:[#allocation2 + $0x30] sm:$0xff]  ;;  %v107_v22 = vld [vmem:[#allocation2 + $0x38] sm:$0xff]  ;;  %v92_v23 = vadd.f32 %v90_v13, %v89_v10  ;;  %v86_v30 = vadd.f32 %v84_v9, %v83_v8 }
  0x2b   :  { %v97_v19 = vmul.f32 %v96_v15, %v95_v14  ;;  %v102_v21 = vld [vmem:[#allocation5 + $0x30] sm:$0xff]  ;;  %v98_v24 = vadd.f32 %v96_v15, %v95_v14  ;;  %v108_v26 = vld [vmem:[#allocation5 + $0x38] sm:$0xff]  ;;  %v113_v27 = vld [vmem:[#allocation2 + $0x40] sm:$0xff]  ;;  %p263_p5 = por %p262_p4, %p261_p3 }
  0x2c   :  { %v103_v25 = vmul.f32 %v102_v21, %v101_v20  ;;  %v114_v28 = vld [vmem:[#allocation5 + $0x40] sm:$0xff]  ;;  %v104_v31 = vadd.f32 %v102_v21, %v101_v20  ;;  %v93_v32 = vadd.f32 %v91_v18, %v67_v6  ;;  %v109_v34 = vmul.f32 %v108_v26, %v107_v22  ;;  %v119_v36 = vld [vmem:[#allocation2 + $0x48] sm:$0xff]  ;;  %v125_v38 = vld [vmem:[#allocation2 + $0x50] sm:$0xff] }
  0x2d   :  { %v99_v33 = vadd.f32 %v97_v19, %v73_v7  ;;  %v115_v35 = vmul.f32 %v114_v28, %v113_v27  ;;  %v120_v37 = vld [vmem:[#allocation5 + $0x48] sm:$0xff]  ;;  %v126_v41 = vld [vmem:[#allocation5 + $0x50] sm:$0xff]  ;;  %v131_v42 = vld [vmem:[#allocation2 + $0x58] sm:$0xff]  ;;  %v94_v44 = vadd.f32 %v92_v23, %v68_v16  ;;  %v100_v45 = vadd.f32 %v98_v24, %v74_v17  ;;  %p264_p6 = pnand %p263_p5, %p257_p2 }
  0x2e   :  { %v105_v39 = vadd.f32 %v103_v25, %v79_v11  ;;  %v121_v40 = vmul.f32 %v120_v37, %v119_v36  ;;  %v132_v43 = vld [vmem:[#allocation5 + $0x58] sm:$0xff]  ;;  %v111_v46 = vadd.f32 %v109_v34, %v85_v12  ;;  %v127_v48 = vmul.f32 %v126_v41, %v125_v38  ;;  %v137_v50 = vld [vmem:[#allocation2 + $0x60] sm:$0xff]  ;;  %v143_v52 = vld [vmem:[#allocation2 + $0x68] sm:$0xff] }
  0x2f   :  { %v117_v47 = vadd.f32 %v115_v35, %v93_v32  ;;  %v133_v49 = vmul.f32 %v132_v43, %v131_v42  ;;  %v138_v51 = vld [vmem:[#allocation5 + $0x60] sm:$0xff]  ;;  %v144_v55 = vld [vmem:[#allocation5 + $0x68] sm:$0xff]  ;;  %v149_v56 = vld [vmem:[#allocation2 + $0x70] sm:$0xff]  ;;  %v106_v58 = vadd.f32 %v104_v31, %v80_v29  ;;  %v110_v59 = vadd.f32 %v108_v26, %v107_v22 }
  0x30   :  { %v123_v53 = vadd.f32 %v121_v40, %v99_v33  ;;  %v139_v54 = vmul.f32 %v138_v51, %v137_v50  ;;  %v150_v57 = vld [vmem:[#allocation5 + $0x70] sm:$0xff]  ;;  %v129_v60 = vadd.f32 %v127_v48, %v105_v39  ;;  %v145_v62 = vmul.f32 %v144_v55, %v143_v52  ;;  %v155_v0 = vld [vmem:[#allocation2 + $0x78] sm:$0xff] }
  0x31   :  { %v135_v61 = vadd.f32 %v133_v49, %v111_v46  ;;  %v151_v63 = vmul.f32 %v150_v57, %v149_v56  ;;  %v156_v1 = vld [vmem:[#allocation5 + $0x78] sm:$0xff]  ;;  %v112_v4 = vadd.f32 %v110_v59, %v86_v30  ;;  %v116_v5 = vadd.f32 %v114_v28, %v113_v27 }
  0x32   :  { %v141_v2 = vadd.f32 %v139_v54, %v117_v47  ;;  %v157_v3 = vmul.f32 %v156_v1, %v155_v0  ;;  %v147_v6 = vadd.f32 %v145_v62, %v123_v53  ;;  %v122_v8 = vadd.f32 %v120_v37, %v119_v36 }
  0x33   :  { %v153_v7 = vadd.f32 %v151_v63, %v129_v60  ;;  %v128_v9 = vadd.f32 %v126_v41, %v125_v38  ;;  %v118_v11 = vadd.f32 %v116_v5, %v94_v44  ;;  %v134_v12 = vadd.f32 %v132_v43, %v131_v42 }
  0x34   :  { %v159_v10 = vadd.f32 %v157_v3, %v135_v61  ;;  %v140_v13 = vadd.f32 %v138_v51, %v137_v50  ;;  %v161_v14 = vadd.f32 %v147_v6, %v141_v2  ;;  %v124_v15 = vadd.f32 %v122_v8, %v100_v45 }
  0x35   :  { %v130_v16 = vadd.f32 %v128_v9, %v106_v58  ;;  %v146_v17 = vadd.f32 %v144_v55, %v143_v52  ;;  %v136_v18 = vadd.f32 %v134_v12, %v112_v4  ;;  %v152_v20 = vadd.f32 %v150_v57, %v149_v56 }
  0x36   :  { %v142_v19 = vadd.f32 %v140_v13, %v118_v11  ;;  %v158_v21 = vadd.f32 %v156_v1, %v155_v0  ;;  %v163_v22 = vadd.f32 %v161_v14, %v153_v7 }
  0x37   :  { %v148_v23 = vadd.f32 %v146_v17, %v124_v15  ;;  %v154_v24 = vadd.f32 %v152_v20, %v130_v16 }
  0x38   :  { %v165_v25 = vadd.f32 %v163_v22, %v159_v10  ;;  %v160_v26 = vadd.f32 %v158_v21, %v136_v18 }
  0x39   :  { %v162_v27 = vadd.f32 %v148_v23, %v142_v19 }
  0x3a   :  { %169 = vst [vmem:[#allocation7] sm:$0xff] %v165_v25 }
  0x3b   :  { %v164_v28 = vadd.f32 %v162_v27, %v154_v24 }
  0x3d   :  { %v166_v29 = vadd.f32 %v164_v28, %v160_v26 }
  0x3e   :  { %267 = shalt.err (!%p264_p6)
}
  0x3f   :  { %s268_s14 = scalar_lea.hbm %s382_s2, 128 }
  0x40   :  { %p269_p7 = scmp.ne.s32.totalorder %s382_s2, %s268_s14  ;;  %p272_p8 = scmp.lt.u32.totalorder %s268_s14, %s382_s2 }
  0x42   :  { %p274_p9 = pnand %p272_p8, %p269_p7 }
  0x44   :  { %277 = shalt.err (!%p274_p9)
}
  0x45   :  { %182 = dma.vmem_to_hbm [thread:$0]  %s180_s8, 128, %s382_s2, [#allocation4]   ;;  %172 = vst [vmem:[#allocation8] sm:$0xff] %v166_v29 }
  0x46   :  { %s278_s21 = scalar_lea.vmem %s190_s10, 128  ;;  %p283_p11 = scmp.lt.s32.totalorder %s190_s10, %s190_s10 }
  0x47   :  { %p279_p10 = scmp.ne.s32.totalorder %s190_s10, %s278_s21  ;;  %p284_p12 = scmp.lt.s32.totalorder %s278_s21, %s278_s21 }
  0x49   :  { %p285_p13 = por %p284_p12, %p283_p11 }
  0x4b   :  { %p286_p0 = pnand %p285_p13, %p279_p10 }
  0x4d   :  { %289 = shalt.err (!%p286_p0)
}
  0x4e   :  { %s290_s24 = scalar_lea.hbm %s383_s3, 128 }
  0x4f   :  { %p291_p1 = scmp.ne.s32.totalorder %s383_s3, %s290_s24  ;;  %p294_p2 = scmp.lt.u32.totalorder %s290_s24, %s383_s3 }
  0x51   :  { %p296_p3 = pnand %p294_p2, %p291_p1 }
  0x53   :  { %299 = shalt.err (!%p296_p3)
}
  0x54   :  { %192 = dma.vmem_to_hbm [thread:$0]  %s190_s10, 128, %s383_s3, [#allocation9]  }
  0x55   :  { %304 = dma.done.wait [#allocation4], 128  }
  0x56   :  { %305 = vsyncadd [#allocation4], 4294967168 }
  0x57   :  { %306 = dma.done.wait [#allocation9], 128  }
  0x58   :  { %307 = vsyncadd [#allocation9], 4294967168 }
  0x59   :  { %199 = vsyncpa [#allocation3], 1 }
  0x5a   :  { %200 = vsyncpa [#allocation6], 1 }
  0x5b   :  { %201 = vsyncpa [#allocation4], 1 }
  0x5c   :  { %202 = vsyncpa [#allocation9], 1 }

</bundles_post_ra>
